<compile_context>
chip_gen: v7x
topology: tpu7x:2x2x1
jax: 0.10.0
libtpu: 0.0.40
codegen_flags: <defaults>
</compile_context>

<pallas_src>
import functools

import jax
import jax.numpy as jnp
from jax import lax
from jax.experimental import pallas as pl
from jax.experimental.pallas import tpu as pltpu

MARGIN = 2.0
EPS = 1e-6  # F.pairwise_distance default eps


def _round_up(x: int, m: int) -> int:
    return ((x + m - 1) // m) * m


def _cdiv(a: int, b: int) -> int:
    return (a + b - 1) // b


def _contrastive_loss_kernel(x1_ref, x2_ref, s_ref, out_ref, *,
                             tile_r, group, batch, tiles_per_split, mask_rows):
    c = pl.program_id(0)       # TensorCore split (parallel)
    i = pl.program_id(1)       # tile within split (reduction)

    @pl.when(i == 0)
    def _init():
        out_ref[...] = jnp.zeros_like(out_ref)

    x1 = x1_ref[...].astype(jnp.float32)
    x2 = x2_ref[...].astype(jnp.float32)
    diff = x1 - x2 + EPS                 # (tile_r, lane_w)
    sq = diff * diff

    if group > 1:
        # Segmented lane reduction on the (otherwise idle) MXU:
        # one-hot S maps each packed 128-lane row to `group` per-row sums.
        seg = jnp.dot(sq, s_ref[...],
                      preferred_element_type=jnp.float32,
                      precision=lax.Precision.HIGHEST)        # (tile_r, group)
    else:
        seg = jnp.sum(sq, axis=-1, keepdims=True)             # exact XLU sum

    dist = jnp.sqrt(seg)                                      # euclidean distance
    hinge = jnp.maximum(MARGIN - dist, 0.0)
    hsq = hinge * hinge                                       # (tile_r, group)

    if mask_rows:
        # Mask padded rows / ragged-tile garbage / duplicated clamped tiles by
        # the true original-row index (computed from the UNclamped tile index).
        row_ids = lax.broadcasted_iota(jnp.int32, (tile_r, group), 0)
        g_ids = lax.broadcasted_iota(jnp.int32, (tile_r, group), 1)
        packed_row = (c * tiles_per_split + i) * tile_r + row_ids
        orig_row = packed_row * group + g_ids
        hsq = jnp.where(orig_row < batch, hsq, 0.0)

    # Single reduction per step; broadcast-accumulate into the resident block.
    out_ref[...] = out_ref[...] + jnp.sum(hsq, keepdims=True)


def contrastive_loss(output1: jax.Array, output2: jax.Array, *, tile_rows=None) -> jax.Array:
    """Scalar f32 contrastive loss, matching the PyTorch module semantics."""
    assert output1.shape == output2.shape and output1.ndim == 2
    B, D = map(int, output1.shape)
    assert B >= 1 and D >= 1
    itemsize = jnp.dtype(output1.dtype).itemsize

    # Lane-dense packing: fold `group` consecutive rows into one packed row.
    if D < 128:
        group = max(1, 128 // D)
        lane_w = group * D
    else:
        group, lane_w = 1, D

    rows = _cdiv(B, group)                 # packed rows carrying data
    b_pad = rows * group                   # pad at most group-1 rows

    # Sublane packing: 8 for f32, 16 for bf16, 32 for int8/fp8.
    pack = 8 * max(1, 4 // itemsize)
    if tile_rows is None:
        target_bytes = 2 << 20             # ~2 MiB per-input blocks (v7x-safe)
        tile_rows = max(pack, target_bytes // (lane_w * itemsize))
    tile_r = max(pack, (int(tile_rows) // pack) * pack)
    tile_r = min(tile_r, 8192, _round_up(rows, pack))

    tiles = _cdiv(rows, tile_r)
    num_splits = 2 if tiles >= 2 else 1    # feed both TCs on v7x; no-op on 1-TC
    tps = _cdiv(tiles, num_splits)
    coverage = num_splits * tps * tile_r * group
    mask_rows = (coverage != B)

    def _prep(x):
        if b_pad != B:
            x = jnp.pad(x, ((0, b_pad - B), (0, 0)))   # <= group-1 zero rows
        return x.reshape(rows, lane_w)                  # free row-major view

    x1 = _prep(output1)
    x2 = _prep(output2)

    # Static one-hot segment matrix: lane l belongs to original-row slot l // D.
    seg_mat = (jnp.arange(lane_w)[:, None] // D
               == jnp.arange(group)[None, :]).astype(jnp.float32)

    def x_map(c, i):
        # Clamp the DMA block index so the 2-way split never reads a fully
        # out-of-range block; duplicated tiles contribute 0 via row masking.
        return (jnp.minimum(c * tps + i, tiles - 1), 0)

    in_block = tile_r * lane_w * itemsize
    f32_block = tile_r * lane_w * 4
    # 2 inputs x 2 pipeline buffers + f32 widened temps (x1,x2,diff,sq) + slack.
    vmem_bytes = int(max(16 << 20,
                         min(48 << 20, 4 * in_block + 4 * f32_block + (2 << 20))))

    kernel = functools.partial(
        _contrastive_loss_kernel,
        tile_r=tile_r, group=group, batch=B,
        tiles_per_split=tps, mask_rows=mask_rows)

    out = pl.pallas_call(
        kernel,
        out_shape=jax.ShapeDtypeStruct((num_splits * 8, 128), jnp.float32),
        grid_spec=pltpu.PrefetchScalarGridSpec(
            num_scalar_prefetch=0,
            grid=(num_splits, tps),
            in_specs=[
                pl.BlockSpec((tile_r, lane_w), x_map),
                pl.BlockSpec((tile_r, lane_w), x_map),
                pl.BlockSpec((lane_w, group), lambda c, i: (0, 0)),  # resident
            ],
            out_specs=pl.BlockSpec((8, 128), lambda c, i: (c, 0)),
        ),
        compiler_params=pltpu.CompilerParams(
            dimension_semantics=("parallel", "arbitrary"),
            vmem_limit_bytes=vmem_bytes,
        ),
    )(x1, x2, seg_mat)

    # Each per-split (8,128) block holds its partial sum broadcast over the block.
    total = out[::8, 0].sum()
    return total / B


def _reference_loss(o1, o2):
    o1 = o1.astype(jnp.float32)
    o2 = o2.astype(jnp.float32)
    d = jnp.sqrt(jnp.sum((o1 - o2 + EPS) ** 2, axis=-1, keepdims=True))
    return jnp.mean(jnp.maximum(MARGIN - d, 0.0) ** 2)


if __name__ == "__main__":
    key = jax.random.PRNGKey(0)
    k1, k2 = jax.random.split(key)

    # Small demo shape consistent with embedding pairs fed to the loss.
    B, D = 8, 32
    scale = 1.5 / (D ** 0.5)   # keep distances near the margin so the clamp matters
    output1 = scale * jax.random.normal(k1, (B, D), dtype=jnp.float32)
    output2 = scale * jax.random.normal(k2, (B, D), dtype=jnp.float32)

    loss = contrastive_loss(output1, output2)
    jax.block_until_ready(loss)
    ref = _reference_loss(output1, output2)
    assert jnp.allclose(loss, ref, rtol=1e-4, atol=1e-6), (loss, ref)

    # Extra coverage: multi-tile grid + 2-way split + row masking, D%128==0 path,
    # generalized packing (D=50), bf16 + (16,128) sublane packing (D=8).
    cases = [
        (37, 32, jnp.float32, 8),
        (23, 384, jnp.float32, 8),
        (10, 50, jnp.float32, None),
        (33, 8, jnp.bfloat16, None),
    ]
    for b, d, dt, tr in cases:
        ka, kb = jax.random.split(jax.random.PRNGKey(b * 1000 + d))
        s = 1.5 / (d ** 0.5)
        a = (s * jax.random.normal(ka, (b, d), dtype=jnp.float32)).astype(dt)
        c = (s * jax.random.normal(kb, (b, d), dtype=jnp.float32)).astype(dt)
        got = contrastive_loss(a, c, tile_rows=tr)
        jax.block_until_ready(got)
        want = _reference_loss(a, c)
        assert jnp.allclose(got, want, rtol=1e-4, atol=1e-5), (b, d, got, want)

    print("KERNEL_OK")
</pallas_src>

<mosaic_0001>
module attributes {stable_mosaic.version = 11 : i64} {
  func.func @_contrastive_loss_kernel(%arg0: i32, %arg1: i32, %arg2: memref<8x128xf32, #tpu.memory_space<vmem>>, %arg3: memref<8x128xf32, #tpu.memory_space<vmem>>, %arg4: memref<128x4xf32, #tpu.memory_space<vmem>>, %arg5: memref<8x128xf32, #tpu.memory_space<vmem>>) attributes {dimension_semantics = [#tpu.dimension_semantics<parallel>, #tpu.dimension_semantics<arbitrary>], iteration_bounds = array<i64: 1, 1>, scalar_prefetch = 0 : i64, scratch_operands = 0 : i64, tpu.core_type = #tpu.core_type<tc>, window_params = [{transform_indices = @transform_0, window_bounds = array<i64: 8, 128>}, {transform_indices = @transform_1, window_bounds = array<i64: 8, 128>}, {pipeline_mode = #tpu.pipeline_mode<synchronous>, transform_indices = @transform_2, window_bounds = array<i64: 128, 4>}, {transform_indices = @transform_3, window_bounds = array<i64: 8, 128>}]} {
    %c0_i32 = arith.constant 0 : i32
    %0 = arith.cmpi eq, %arg1, %c0_i32 : i32
    %1 = arith.extui %0 : i1 to i32
    %c0_i32_0 = arith.constant 0 : i32
    %2 = arith.cmpi ne, %1, %c0_i32_0 : i32
    scf.if %2 {
      %cst_16 = arith.constant 0.000000e+00 : f32
      %40 = vector.broadcast %cst_16 : f32 to vector<8x128xf32>
      %c0_17 = arith.constant 0 : index
      %c0_18 = arith.constant 0 : index
      %41 = vector.load %arg5[%c0_17, %c0_18] : memref<8x128xf32, #tpu.memory_space<vmem>>, vector<8x128xf32>
      tpu.vector_store %arg5[%c0_17, %c0_18], %40 {strides = array<i32>} : memref<8x128xf32, #tpu.memory_space<vmem>>, vector<8x128xf32>,
    } else {
    }
    %c0 = arith.constant 0 : index
    %c0_1 = arith.constant 0 : index
    %3 = vector.load %arg2[%c0, %c0_1] : memref<8x128xf32, #tpu.memory_space<vmem>>, vector<8x128xf32>
    %c0_2 = arith.constant 0 : index
    %c0_3 = arith.constant 0 : index
    %4 = vector.load %arg3[%c0_2, %c0_3] : memref<8x128xf32, #tpu.memory_space<vmem>>, vector<8x128xf32>
    %5 = arith.subf %3, %4 : vector<8x128xf32>
    %cst = arith.constant 9.99999997E-7 : f32
    %6 = vector.broadcast %cst : f32 to vector<8x128xf32>
    %7 = arith.addf %5, %6 : vector<8x128xf32>
    %8 = arith.mulf %7, %7 : vector<8x128xf32>
    %c0_4 = arith.constant 0 : index
    %c0_5 = arith.constant 0 : index
    %9 = vector.load %arg4[%c0_4, %c0_5] : memref<128x4xf32, #tpu.memory_space<vmem>>, vector<128x4xf32>
    %cst_6 = arith.constant dense<0.000000e+00> : vector<8x4xf32>
    %10 = tpu.matmul %8, %9, %cst_6 {dimension_numbers = #tpu.dot_dimension_numbers<[1], [0], [0], [1], [0, 0, 1, 1], [], []>, precision = #tpu.contract_precision<fp32>} : vector<8x128xf32>, vector<128x4xf32>, vector<8x4xf32> -> vector<8x4xf32>
    %11 = math.sqrt %10 : vector<8x4xf32>
    %cst_7 = arith.constant 2.000000e+00 : f32
    %12 = vector.broadcast %cst_7 : f32 to vector<8x4xf32>
    %13 = arith.subf %12, %11 : vector<8x4xf32>
    %cst_8 = arith.constant 0.000000e+00 : f32
    %14 = vector.broadcast %cst_8 : f32 to vector<8x4xf32>
    %15 = arith.maximumf %13, %14 : vector<8x4xf32>
    %16 = arith.mulf %15, %15 : vector<8x4xf32>
    %17 = tpu.iota {dimensions = array<i32: 0>} : vector<8x4xi32>
    %18 = tpu.iota {dimensions = array<i32: 1>} : vector<8x4xi32>
    %c1_i32 = arith.constant 1 : i32
    %19 = arith.muli %arg0, %c1_i32 : i32
    %20 = arith.addi %19, %arg1 : i32
    %c8_i32 = arith.constant 8 : i32
    %21 = arith.muli %20, %c8_i32 : i32
    %22 = vector.broadcast %21 : i32 to vector<8x4xi32>
    %23 = arith.addi %22, %17 : vector<8x4xi32>
    %c4_i32 = arith.constant 4 : i32
    %24 = vector.broadcast %c4_i32 : i32 to vector<8x4xi32>
    %25 = arith.muli %23, %24 : vector<8x4xi32>
    %26 = arith.addi %25, %18 : vector<8x4xi32>
    %c8_i32_9 = arith.constant 8 : i32
    %27 = vector.broadcast %c8_i32_9 : i32 to vector<8x4xi32>
    %28 = arith.cmpi slt, %26, %27 : vector<8x4xi32>
    %cst_10 = arith.constant 0.000000e+00 : f32
    %29 = vector.broadcast %cst_10 : f32 to vector<8x4xf32>
    %30 = arith.select %28, %16, %29 : vector<8x4xi1>, vector<8x4xf32>
    %c0_11 = arith.constant 0 : index
    %c0_12 = arith.constant 0 : index
    %31 = vector.load %arg5[%c0_11, %c0_12] : memref<8x128xf32, #tpu.memory_space<vmem>>, vector<8x128xf32>
    %32 = vector.shape_cast %30 : vector<8x4xf32> to vector<1x8x4xf32>
    %cst_13 = arith.constant dense<0.000000e+00> : vector<1xf32>
    %33 = vector.multi_reduction <add>, %32, %cst_13 [1, 2] : vector<1x8x4xf32> to vector<1xf32>
    %34 = vector.shape_cast %33 : vector<1xf32> to vector<1x1x1xf32>
    %35 = vector.extract %34[0, 0, 0] : f32 from vector<1x1x1xf32>
    %36 = vector.broadcast %35 : f32 to vector<1x1xf32>
    %37 = vector.broadcast %36 : vector<1x1xf32> to vector<8x128xf32>
    %38 = arith.addf %31, %37 : vector<8x128xf32>
    %c0_14 = arith.constant 0 : index
    %c0_15 = arith.constant 0 : index
    %39 = vector.load %arg5[%c0_14, %c0_15] : memref<8x128xf32, #tpu.memory_space<vmem>>, vector<8x128xf32>
    tpu.vector_store %arg5[%c0_14, %c0_15], %38 {strides = array<i32>} : memref<8x128xf32, #tpu.memory_space<vmem>>, vector<8x128xf32>,
    return
  }
  func.func @transform_0(%arg0: i32, %arg1: i32) -> (i32, i32) {
    %c1_i32 = arith.constant 1 : i32
    %0 = arith.muli %arg0, %c1_i32 : i32
    %1 = arith.addi %0, %arg1 : i32
    %c0_i32 = arith.constant 0 : i32
    %2 = arith.minsi %1, %c0_i32 : i32
    %c0_i32_0 = arith.constant 0 : i32
    %c0_i32_1 = arith.constant 0 : i32
    return %2, %c0_i32_0 : i32, i32
  }
  func.func @transform_1(%arg0: i32, %arg1: i32) -> (i32, i32) {
    %c1_i32 = arith.constant 1 : i32
    %0 = arith.muli %arg0, %c1_i32 : i32
    %1 = arith.addi %0, %arg1 : i32
    %c0_i32 = arith.constant 0 : i32
    %2 = arith.minsi %1, %c0_i32 : i32
    %c0_i32_0 = arith.constant 0 : i32
    %c0_i32_1 = arith.constant 0 : i32
    return %2, %c0_i32_0 : i32, i32
  }
  func.func @transform_2(%arg0: i32, %arg1: i32) -> (i32, i32) {
    %c0_i32 = arith.constant 0 : i32
    %c0_i32_0 = arith.constant 0 : i32
    %c0_i32_1 = arith.constant 0 : i32
    return %c0_i32, %c0_i32_0 : i32, i32
  }
  func.func @transform_3(%arg0: i32, %arg1: i32) -> (i32, i32) {
    %c0_i32 = arith.constant 0 : i32
    %c0_i32_0 = arith.constant 0 : i32
    return %arg0, %c0_i32 : i32, i32
  }
}

</mosaic_0001>

<bundles_post_ra>
// kernel: tpu_custom_call.1
= control target key start
LH: loop header
LB: loop body
LE: loop exit
PB: predicated region body
PF: predicated region fallthrough
CT: control target
= control target key end

     0   :  { %v1326_v3 = vmov 0.0|0.0   ;;  %vm1327_vm0 = vmmov 0   ;;  %v1328_v11 = vmov 0.0   ;;  %s1679_s0 = inlined_call_operand.vmem [shape: f32[2,128], index: 0, kind: input, shape index: {}]   ;;  %s1680_s1 = inlined_call_operand.vmem [shape: f32[2,128], index: 1, kind: input, shape index: {}]   ;;  %s1681_s2 = inlined_call_operand.vmem [shape: f32[128,4], index: 2, kind: input, shape index: {}]   ;;  %s1682_s3 = inlined_call_operand.hbm [shape: f32[8,128], index: 3, kind: output, shape index: {}]  }
   0x1   :  { %v109_v0 = vld [vmem:[%s1681_s2] sm:$0xff]  ;;  %v110_v1 = vld [vmem:[%s1681_s2 + $0x8] sm:$0xff]  ;;  %v111_v2 = vld [vmem:[%s1681_s2 + $0x10] sm:$0xff]  ;;  %1141 = vmatprep.subr.bf16.mxu1 %v1326_v3  ;;  %1213 = vmatprep.subr.bf16.mxu0 %v1326_v3 }
   0x2   :  { %v126_v4 = vand.u32 4294901760, %v109_v0  ;;  %v129_v5 = vand.u32 4294901760, %v110_v1  ;;  %v112_v6 = vld [vmem:[%s1681_s2 + $0x18] sm:$0xff]  ;;  %v132_v7 = vand.u32 4294901760, %v111_v2  ;;  %v1367_v9 = vld [vmem:[%s1681_s2 + $0x20] sm:$0xff]  ;;  %v1372_v10 = vld [vmem:[%s1681_s2 + $0x28] sm:$0xff]  ;;  %963 = vmatprep.mubr.msk.f32.mxu1 %vm1327_vm0, %v1328_v11  ;;  %1068 = vmatprep.mubr.msk.f32.mxu0 %vm1327_vm0, %v1328_v11 }
   0x3   :  { %v135_v8 = vand.u32 4294901760, %v112_v6  ;;  %v138_v14 = vand.u32 4294901760, %v1367_v9  ;;  %v141_v15 = vand.u32 4294901760, %v1372_v10  ;;  %v1391_v16 = vld [vmem:[%s1681_s2 + $0x30] sm:$0xff]  ;;  %v1396_v17 = vld [vmem:[%s1681_s2 + $0x38] sm:$0xff] }
   0x4   :  { %v1378_v12 = vpack.c.bf16 %v129_v5, %v126_v4 }
   0x5   :  { %v1382_v13 = vpack.c.bf16 %v135_v8, %v132_v7 }
   0x6   :  { %1143 = vmatpush3.bf16.msra.mxu1 %v1378_v12  ;;  %1215 = vmatpush3.bf16.msra.mxu0 %v1378_v12 }
   0x7   :  { %1144 = vmatprep.subr.bf16.mxu1 %v1326_v3  ;;  %1216 = vmatprep.subr.bf16.mxu0 %v1326_v3 }
   0x8   :  { %8 = vsyncpa [#allocation3], 0  ;;  %v104_v18 = vld [vmem:[%s1679_s0] sm:$0xff]  ;;  %v1406_v20 = vpack.c.bf16 %v141_v15, %v138_v14  ;;  %v144_v21 = vand.u32 4294901760, %v1391_v16  ;;  %v147_v22 = vand.u32 4294901760, %v1396_v17  ;;  %v1420_v24 = vld [vmem:[%s1681_s2 + $0x48] sm:$0xff]  ;;  %v1440_v33 = vsub.f32 %v109_v0, %v126_v4 }
   0x9   :  { %v105_v19 = vld [vmem:[%s1680_s1] sm:$0xff]  ;;  %v153_v29 = vand.u32 4294901760, %v1420_v24  ;;  %v1433_v30 = vld [vmem:[%s1681_s2 + $0x50] sm:$0xff]  ;;  %v1438_v31 = vld [vmem:[%s1681_s2 + $0x58] sm:$0xff]  ;;  %v1444_v35 = vsub.f32 %v110_v1, %v129_v5  ;;  %v1464_v41 = vsub.f32 %v111_v2, %v132_v7  ;;  %v1466_v42 = vsub.f32 %v112_v6, %v135_v8 }
   0xa   :  { %1146 = vmatpush3.bf16.msra.mxu1 %v1382_v13  ;;  %1218 = vmatpush3.bf16.msra.mxu0 %v1382_v13  ;;  %v1415_v23 = vld [vmem:[%s1681_s2 + $0x40] sm:$0xff]  ;;  %v106_v25 = vsub.f32 %v104_v18, %v105_v19  ;;  %v1424_v27 = vpack.c.bf16 %v147_v22, %v144_v21  ;;  %v156_v37 = vand.u32 4294901760, %v1433_v30  ;;  %v159_v38 = vand.u32 4294901760, %v1438_v31  ;;  %v1462_v40 = vld [vmem:[%s1681_s2 + $0x68] sm:$0xff]  ;;  %v1484_v47 = vld [vmem:[%s1681_s2 + $0x70] sm:$0xff] }
   0xb   :  { %1147 = vmatprep.subr.bf16.mxu1 %v1326_v3  ;;  %1219 = vmatprep.subr.bf16.mxu0 %v1326_v3  ;;  %v150_v28 = vand.u32 4294901760, %v1415_v23  ;;  %v1455_v39 = vld [vmem:[%s1681_s2 + $0x60] sm:$0xff]  ;;  %v165_v46 = vand.u32 4294901760, %v1462_v40  ;;  %v1489_v48 = vld [vmem:[%s1681_s2 + $0x78] sm:$0xff]  ;;  %v219_v49 = vand.u32 4294901760, %v1440_v33  ;;  %v226_v50 = vand.u32 4294901760, %v1444_v35 }
   0xc   :  { %v107_v26 = vadd.f32 1e-06, %v106_v25  ;;  %v162_v43 = vand.u32 4294901760, %v1455_v39  ;;  %v1478_v45 = vpack.c.bf16 %v159_v38, %v156_v37  ;;  %v1496_v51 = vsub.f32 %v1367_v9, %v138_v14  ;;  %s1329_s2 = smov [#allocation2]  }
   0xd   :  { %v1448_v36 = vpack.c.bf16 %v153_v29, %v150_v28  ;;  %v1499_v52 = vsub.f32 %v1372_v10, %v141_v15  ;;  %v168_v53 = vand.u32 4294901760, %v1484_v47  ;;  %v171_v54 = vand.u32 4294901760, %v1489_v48  ;;  %s809_s19 = sshll.u32 %s1329_s2, 4  ;;  %s810_s19 = int_to_ptr.vmem [resolvable:$true] %s809_s19 }
   0xe   :  { %1149 = vmatpush3.bf16.msra.mxu1 %v1406_v20  ;;  %1221 = vmatpush3.bf16.msra.mxu0 %v1406_v20  ;;  %v108_v32 = vmul.f32 %v107_v26, %v107_v26  ;;  %v233_v56 = vand.u32 4294901760, %v1464_v41  ;;  %v1511_v57 = vpack.c.bf16 %v165_v46, %v162_v43  ;;  %v220_v58 = vsub.f32 %v1440_v33, %v219_v49  ;;  %s1302_s21 = scalar_lea.vmem %s810_s19, 128  ;;  %p1307_p1 = scmp.lt.s32.totalorder %s810_s19, %s810_s19 }
   0xf   :  { %1150 = vmatprep.subr.bf16.mxu1 %v1326_v3  ;;  %1222 = vmatprep.subr.bf16.mxu0 %v1326_v3  ;;  %v227_v59 = vsub.f32 %v1444_v35, %v226_v50  ;;  %v240_v60 = vand.u32 4294901760, %v1466_v42  ;;  %v1519_v61 = vsub.f32 %v1391_v16, %v144_v21  ;;  %v1522_v62 = vsub.f32 %v1396_v17, %v147_v22  ;;  %p1303_p0 = scmp.ne.s32.totalorder %s810_s19, %s1302_s21  ;;  %p1308_p2 = scmp.lt.s32.totalorder %s1302_s21, %s1302_s21 }
  0x10   :  { %v1442_v34 = vand.u32 4294901760, %v108_v32  ;;  %v234_v0 = vsub.f32 %v1464_v41, %v233_v56  ;;  %v247_v1 = vand.u32 4294901760, %v1496_v51  ;;  %v254_v2 = vand.u32 4294901760, %v1499_v52 }
  0x11   :  { %v1534_v4 = vpack.c.bf16 %v171_v54, %v168_v53  ;;  %v221_v5 = vand.u32 4294901760, %v220_v58  ;;  %v228_v6 = vand.u32 4294901760, %v227_v59  ;;  %v241_v7 = vsub.f32 %v1466_v42, %v240_v60  ;;  %p1309_p3 = por %p1308_p2, %p1307_p1 }
  0x12   :  { %1152 = vmatpush3.bf16.msra.mxu1 %v1424_v27  ;;  %1224 = vmatpush3.bf16.msra.mxu0 %v1424_v27  ;;  %v1470_v44 = vsub.f32 %v108_v32, %v1442_v34  ;;  %v1540_v8 = vsub.f32 %v1415_v23, %v150_v28  ;;  %v1543_v9 = vsub.f32 %v1420_v24, %v153_v29  ;;  %v235_v15 = vand.u32 4294901760, %v234_v0 }
  0x13   :  { %1153 = vmatprep.subr.bf16.mxu1 %v1326_v3  ;;  %1225 = vmatprep.subr.bf16.mxu0 %v1326_v3  ;;  %v1238_v10 = vpack.c.bf16 %v226_v50, %v219_v49  ;;  %v248_v16 = vsub.f32 %v1496_v51, %v247_v1  ;;  %v255_v17 = vsub.f32 %v1499_v52, %v254_v2  ;;  %v242_v19 = vand.u32 4294901760, %v241_v7  ;;  %p1310_p4 = pnand %p1309_p3, %p1303_p0 }
  0x14   :  { %v208_v55 = vand.u32 4294901760, %v1470_v44  ;;  %v1166_v18 = vpack.c.bf16 %v228_v6, %v221_v5  ;;  %v261_v21 = vand.u32 4294901760, %v1519_v61  ;;  %v268_v22 = vand.u32 4294901760, %v1522_v62 }
  0x15   :  { %v1556_v23 = vsub.f32 %v1433_v30, %v156_v37  ;;  %v1561_v24 = vsub.f32 %v1438_v31, %v159_v38  ;;  %v1241_v25 = vpack.c.bf16 %v240_v60, %v233_v56  ;;  %v249_v26 = vand.u32 4294901760, %v248_v16 }
  0x16   :  { %1155 = vmatpush3.bf16.msra.mxu1 %v1448_v36  ;;  %1227 = vmatpush3.bf16.msra.mxu0 %v1448_v36  ;;  %v209_v63 = vsub.f32 %v1470_v44, %v208_v55  ;;  %v256_v28 = vand.u32 4294901760, %v255_v17  ;;  %v275_v29 = vand.u32 4294901760, %v1540_v8  ;;  %v1169_v32 = vpack.c.bf16 %v242_v19, %v235_v15 }
  0x17   :  { %1156 = vmatprep.subr.bf16.mxu1 %v1326_v3  ;;  %1228 = vmatprep.subr.bf16.mxu0 %v1326_v3  ;;  %v262_v49 = vsub.f32 %v1519_v61, %v261_v21  ;;  %v269_v30 = vsub.f32 %v1522_v62, %v268_v22  ;;  %v282_v37 = vand.u32 4294901760, %v1543_v9  ;;  %v1572_v31 = vsub.f32 %v1455_v39, %v162_v43 }
  0x18   :  { %v210_v14 = vand.u32 4294901760, %v209_v63  ;;  %v1577_v38 = vsub.f32 %v1462_v40, %v165_v46  ;;  %v1244_v50 = vpack.c.bf16 %v254_v2, %v247_v1  ;;  %v289_v56 = vand.u32 4294901760, %v1556_v23 }
  0x19   :  { %v296_v58 = vand.u32 4294901760, %v1561_v24  ;;  %v1172_v39 = vpack.c.bf16 %v256_v28, %v249_v26  ;;  %v263_v43 = vand.u32 4294901760, %v262_v49  ;;  %v270_v59 = vand.u32 4294901760, %v269_v30 }
  0x1a   :  { %1158 = vmatpush3.bf16.msra.mxu1 %v1478_v45  ;;  %1230 = vmatpush3.bf16.msra.mxu0 %v1478_v45  ;;  %v283_v40 = vsub.f32 %v1543_v9, %v282_v37  ;;  %v1592_v46 = vsub.f32 %v1484_v47, %v168_v53  ;;  %v1597_v60 = vsub.f32 %v1489_v48, %v171_v54  ;;  %v303_v7 = vand.u32 4294901760, %v1572_v31 }
  0x1b   :  { %1159 = vmatprep.subr.bf16.mxu1 %v1326_v3  ;;  %1231 = vmatprep.subr.bf16.mxu0 %v1326_v3  ;;  %v1247_v63 = vpack.c.bf16 %v268_v22, %v261_v21  ;;  %v290_v1 = vsub.f32 %v1556_v23, %v289_v56  ;;  %v297_v2 = vsub.f32 %v1561_v24, %v296_v58  ;;  %v310_v47 = vand.u32 4294901760, %v1577_v38 }
  0x1c   :  { %v1175_v5 = vpack.c.bf16 %v270_v59, %v263_v43  ;;  %v284_v6 = vand.u32 4294901760, %v283_v40  ;;  %v1250_v48 = vpack.c.bf16 %v282_v37, %v275_v29  ;;  %v304_v15 = vsub.f32 %v1572_v31, %v303_v7 }
  0x1d   :  { %v291_v53 = vand.u32 4294901760, %v290_v1  ;;  %v298_v54 = vand.u32 4294901760, %v297_v2  ;;  %v311_v16 = vsub.f32 %v1577_v38, %v310_v47  ;;  %v324_v17 = vand.u32 4294901760, %v1597_v60 }
  0x1e   :  { %1161 = vmatpush3.bf16.msra.mxu1 %v1511_v57  ;;  %1233 = vmatpush3.bf16.msra.mxu0 %v1511_v57  ;;  %v1253_v19 = vpack.c.bf16 %v296_v58, %v289_v56  ;;  %v305_v21 = vand.u32 4294901760, %v304_v15  ;;  %vm789_vm4 = vcmask 31744  }
  0x1f   :  { %1162 = vmatprep.subr.bf16.mxu1 %v1326_v3  ;;  %1234 = vmatprep.subr.bf16.mxu0 %v1326_v3  ;;  %v312_v22 = vand.u32 4294901760, %v311_v16  ;;  %v325_v26 = vsub.f32 %v1597_v60, %v324_v17 }
  0x21   :  { %v1184_v28 = vpack.c.bf16 %v312_v22, %v305_v21  ;;  %v326_v49 = vand.u32 4294901760, %v325_v26 }
  0x22   :  { %1164 = vmatpush3.bf16.msra.mxu1 %v1534_v4  ;;  %1236 = vmatpush3.bf16.msra.mxu0 %v1534_v4 }
  0x23   :  { %1165 = vmatprep.subr.bf16.mxu1 %v1326_v3  ;;  %1237 = vmatprep.subr.bf16.mxu0 %v1326_v3 }
  0x25   :  { %964 = vmatmul.mubr.f32.vlgmr.msra.gmra.mrb[0].mxu1 %v210_v14  ;;  %1069 = vmatmul.mubr.f32.vlgmr.msra.gmra.mrb[0].mxu0 %v208_v55  ;;  %v276_v55 = vsub.f32 %v1540_v8, %v275_v29  ;;  %v1256_v29 = vpack.c.bf16 %v310_v47, %v303_v7 }
  0x26   :  { %1167 = vmatpush3.bf16.msra.mxu1 %v1166_v18  ;;  %1239 = vmatpush3.bf16.msra.mxu0 %v1238_v10  ;;  %v317_v10 = vand.u32 4294901760, %v1592_v46  ;;  %v1181_v18 = vpack.c.bf16 %v298_v54, %v291_v53 }
  0x27   :  { %1168 = vmatprep.subr.bf16.mxu1 %v1326_v3  ;;  %1240 = vmatprep.subr.bf16.mxu0 %v1326_v3  ;;  %v277_v0 = vand.u32 4294901760, %v276_v55  ;;  %v1193_v55 = vpack.c.bf16 %v1466_v42, %v1464_v41 }
  0x28   :  { %998 = vmatprep.mubr.msk.f32.mxu1 %vm1327_vm0, %v1328_v11  ;;  %1103 = vmatprep.mubr.msk.f32.mxu0 %vm1327_vm0, %v1328_v11  ;;  %v1259_v37 = vpack.c.bf16 %v324_v17, %v317_v10 }
  0x29   :  { %v1178_v14 = vpack.c.bf16 %v284_v6, %v277_v0 }
  0x2a   :  { %1170 = vmatpush3.bf16.msra.mxu1 %v1169_v32  ;;  %1242 = vmatpush3.bf16.msra.mxu0 %v1241_v25  ;;  %v318_v25 = vsub.f32 %v1592_v46, %v317_v10 }
  0x2b   :  { %1171 = vmatprep.subr.bf16.mxu1 %v1326_v3  ;;  %1243 = vmatprep.subr.bf16.mxu0 %v1326_v3 }
  0x2c   :  { %v319_v32 = vand.u32 4294901760, %v318_v25 }
  0x2e   :  { %1173 = vmatpush3.bf16.msra.mxu1 %v1172_v39  ;;  %1245 = vmatpush3.bf16.msra.mxu0 %v1244_v50  ;;  %v1187_v30 = vpack.c.bf16 %v326_v49, %v319_v32  ;;  %v1190_v50 = vpack.c.bf16 %v1444_v35, %v1440_v33  ;;  %v1196_v33 = vpack.c.bf16 %v1499_v52, %v1496_v51  ;;  %v776_v51 = vlaneseq }
  0x2f   :  { %1174 = vmatprep.subr.bf16.mxu1 %v1326_v3  ;;  %1246 = vmatprep.subr.bf16.mxu0 %v1326_v3 }
  0x30   :  { %v777_v52 = vshrl.u32 %v776_v51, 7 }
  0x32   :  { %1176 = vmatpush3.bf16.msra.mxu1 %v1175_v5  ;;  %1248 = vmatpush3.bf16.msra.mxu0 %v1247_v63 }
  0x33   :  { %1177 = vmatprep.subr.bf16.mxu1 %v1326_v3  ;;  %1249 = vmatprep.subr.bf16.mxu0 %v1326_v3 }
  0x36   :  { %1179 = vmatpush3.bf16.msra.mxu1 %v1178_v14  ;;  %1251 = vmatpush3.bf16.msra.mxu0 %v1250_v48 }
  0x37   :  { %1180 = vmatprep.subr.bf16.mxu1 %v1326_v3  ;;  %1252 = vmatprep.subr.bf16.mxu0 %v1326_v3 }
  0x3a   :  { %1182 = vmatpush3.bf16.msra.mxu1 %v1181_v18  ;;  %1254 = vmatpush3.bf16.msra.mxu0 %v1253_v19 }
  0x3b   :  { %1183 = vmatprep.subr.bf16.mxu1 %v1326_v3  ;;  %1255 = vmatprep.subr.bf16.mxu0 %v1326_v3 }
  0x3e   :  { %1185 = vmatpush3.bf16.msra.mxu1 %v1184_v28  ;;  %1257 = vmatpush3.bf16.msra.mxu0 %v1256_v29 }
  0x3f   :  { %1186 = vmatprep.subr.bf16.mxu1 %v1326_v3  ;;  %1258 = vmatprep.subr.bf16.mxu0 %v1326_v3 }
  0x42   :  { %1188 = vmatpush3.bf16.msra.mxu1 %v1187_v30  ;;  %1260 = vmatpush3.bf16.msra.mxu0 %v1259_v37 }
  0x43   :  { %1189 = vmatprep.subr.bf16.mxu1 %v1326_v3  ;;  %1261 = vmatprep.subr.bf16.mxu0 %v1326_v3 }
  0x45   :  { %999 = vmatmul.mubr.f32.vlgmr.msra.gmra.mrb[0].mxu1 %v1442_v34  ;;  %1104 = vmatmul.mubr.f32.vlgmr.msra.gmra.mrb[0].mxu0 %v1442_v34 }
  0x46   :  { %1191 = vmatpush3.bf16.msra.mxu1 %v1190_v50  ;;  %1263 = vmatpush3.bf16.msra.mxu0 %v1378_v12  ;;  %v1199_v12 = vpack.c.bf16 %v1522_v62, %v1519_v61  ;;  %v779_v61 = vand.u32 127, %v776_v51  ;;  %v784_v62 = vmul.u32 4, %v777_v52 }
  0x47   :  { %1192 = vmatprep.subr.bf16.mxu1 %v1326_v3  ;;  %1264 = vmatprep.subr.bf16.mxu0 %v1326_v3 }
  0x48   :  { %1033 = vmatprep.mubr.msk.f32.mxu1 %vm1327_vm0, %v1328_v11  ;;  %1138 = vmatprep.mubr.msk.f32.mxu0 %vm1327_vm0, %v1328_v11  ;;  %v1202_v11 = vpack.c.bf16 %v1543_v9, %v1540_v8 }
  0x4a   :  { %1194 = vmatpush3.bf16.msra.mxu1 %v1193_v55  ;;  %1266 = vmatpush3.bf16.msra.mxu0 %v1382_v13  ;;  %v1205_v13 = vpack.c.bf16 %v1561_v24, %v1556_v23 }
  0x4b   :  { %1195 = vmatprep.subr.bf16.mxu1 %v1326_v3  ;;  %1267 = vmatprep.subr.bf16.mxu0 %v1326_v3 }
  0x4e   :  { %1197 = vmatpush3.bf16.msra.mxu1 %v1196_v33  ;;  %1269 = vmatpush3.bf16.msra.mxu0 %v1406_v20  ;;  %v1208_v20 = vpack.c.bf16 %v1577_v38, %v1572_v31 }
  0x4f   :  { %1198 = vmatprep.subr.bf16.mxu1 %v1326_v3  ;;  %1270 = vmatprep.subr.bf16.mxu0 %v1326_v3 }
  0x52   :  { %1200 = vmatpush3.bf16.msra.mxu1 %v1199_v12  ;;  %1272 = vmatpush3.bf16.msra.mxu0 %v1424_v27  ;;  %v1211_v27 = vpack.c.bf16 %v1597_v60, %v1592_v46 }
  0x53   :  { %1201 = vmatprep.subr.bf16.mxu1 %v1326_v3  ;;  %1273 = vmatprep.subr.bf16.mxu0 %v1326_v3 }
  0x56   :  { %1203 = vmatpush3.bf16.msra.mxu1 %v1202_v11  ;;  %1275 = vmatpush3.bf16.msra.mxu0 %v1448_v36 }
  0x57   :  { %1204 = vmatprep.subr.bf16.mxu1 %v1326_v3  ;;  %1276 = vmatprep.subr.bf16.mxu0 %v1326_v3 }
  0x5a   :  { %1206 = vmatpush3.bf16.msra.mxu1 %v1205_v13  ;;  %1278 = vmatpush3.bf16.msra.mxu0 %v1478_v45 }
  0x5b   :  { %1207 = vmatprep.subr.bf16.mxu1 %v1326_v3  ;;  %1279 = vmatprep.subr.bf16.mxu0 %v1326_v3 }
  0x5e   :  { %1209 = vmatpush3.bf16.msra.mxu1 %v1208_v20  ;;  %1281 = vmatpush3.bf16.msra.mxu0 %v1511_v57 }
  0x5f   :  { %1210 = vmatprep.subr.bf16.mxu1 %v1326_v3  ;;  %1282 = vmatprep.subr.bf16.mxu0 %v1326_v3 }
  0x62   :  { %1212 = vmatpush3.bf16.msra.mxu1 %v1211_v27  ;;  %1284 = vmatpush3.bf16.msra.mxu0 %v1534_v4 }
  0x65   :  { %1034 = vmatmul.mubr.f32.vlgmr.msra.gmra.mrb[0].mxu1 %v1470_v44  ;;  %1139 = vmatmul.mubr.f32.vlgmr.msra.gmra.mrb[0].mxu0 %v1442_v34  ;;  %v785_v44 = vadd.s32 %v784_v62, %v779_v61 }
  0x67   :  { %vm786_vm3 = vcmp.lt.s32.totalorder %v785_v44, 8 }
 0x138   :  { %v467_v35 = vpop.f32.mrb[0].mxu1  ;;  %v762_v36 = vpop.f32.mrb[0].mxu0 }
 0x139   :  { %v1285_v41 = vadd.f32 %v762_v36, %v467_v35  ;;  %v1035_v42 = vpop.f32.mrb[1].mxu1  ;;  %v1140_v45 = vpop.f32.mrb[1].mxu0 }
 0x13b   :  { %1300 = vrsqrt.f32 %v1285_v41  ;;  %vm768_vm1 = vcmp.eq.f32.partialorder %v1285_v41, inf  ;;  %v771_v3 = vand.u32 2147483648, %v1285_v41  ;;  %vm770_vm2 = vcmp.eq.f32.partialorder %v1285_v41, 0.0 }
 0x145   :  { %v1301_v57 = vpop.eup %1300 }
 0x146   :  { %v767_v8 = vmul.f32 %v1301_v57, %v1285_v41 }
 0x148   :  { %v769_v9 = vsel %vm768_vm1, %v1285_v41, %v767_v8 }
 0x149   :  { %v772_v4 = vsel %vm770_vm2, %v771_v3, %v769_v9 }
 0x14a   :  { %v773_v23 = vsub.f32 2.0, %v772_v4 }
 0x14c   :  { %v774_v34 = vmax.f32 %v773_v23, 0.0 }
 0x14e   :  { %v775_v24 = vmul.f32 %v774_v34, %v774_v34 }
 0x150   :  { %v787_v31 = vsel %vm786_vm3, %v775_v24, 0.0 }
 0x151   :  { %v790_v38 = vsel %vm789_vm4, %v787_v31, 0.0 }
 0x152   :  { %791 = vadd.xlane.f32.xlu0 %v790_v38 }
 0x1df   :  { %v792_v56 = vpop.xlane.xlu0 %791 }
 0x1e0   :  { %v793_v58 = vrot.slane %v792_v56, 4 }
 0x1e2   :  { %v794_v39 = vadd.f32 %v793_v58, %v792_v56 }
 0x1e4   :  { %v795_v43 = vrot.slane %v794_v39, 2 }
 0x1e6   :  { %v796_v59 = vadd.f32 %v795_v43, %v794_v39 }
 0x1e8   :  { %v797_v40 = vrot.slane %v796_v59, 1 }
 0x1ea   :  { %v798_v46 = vadd.f32 %v797_v40, %v796_v59 }
 0x1ec   :  { %1294 = vpush %v798_v46 }
 0x21d   :  { %s1295_s20 = spop %1294 }
 0x21e   :  { %v800_v60 = vstv %s1295_s20 }
 0x21f   :  { %802 = vst [vmem:[#allocation2] sm:$0xff] %v800_v60 }
 0x220   :  { %1313 = shalt.err (!%p1310_p4)
}
 0x221   :  { %s1314_s24 = scalar_lea.hbm %s1682_s3, 128 }
 0x222   :  { %p1315_p5 = scmp.ne.s32.totalorder %s1682_s3, %s1314_s24  ;;  %p1318_p6 = scmp.lt.u32.totalorder %s1314_s24, %s1682_s3 }
 0x224   :  { %p1320_p7 = pnand %p1318_p6, %p1315_p5 }
 0x226   :  { %1323 = shalt.err (!%p1320_p7)
}
 0x227   :  { %812 = dma.vmem_to_hbm [thread:$0]  %s810_s19, 128, %s1682_s3, [#allocation3]  }
 0x228   :  { %1324 = dma.done.wait [#allocation3], 128  }
 0x229   :  { %1325 = vsyncadd [#allocation3], 4294967168 }
 0x22a   :  { %816 = vsyncpa [#allocation3], 1 }

</bundles_post_ra>
